<compile_context>
chip_gen: v7x
topology: tpu7x:2x2x1
jax: 0.10.0
libtpu: 0.0.40
codegen_flags: <defaults>
</compile_context>

<pallas_src>
import jax
import jax.numpy as jnp
from jax.experimental import pallas as pl
from jax.experimental.pallas import tpu as pltpu

_LANES = 128


def _mish_kernel(x_ref, o_ref):
    # Elementwise Mish in f32 for accuracy, cast back to the output dtype.
    x = x_ref[...].astype(jnp.float32)
    # Numerically stable softplus: log(1 + exp(x)) == logaddexp(x, 0).
    sp = jnp.logaddexp(x, 0.0)
    o_ref[...] = (x * jnp.tanh(sp)).astype(o_ref.dtype)


def mish(x, *, tile_rows=4096):
    """Apply Mish elementwise to an arbitrarily-shaped array via Pallas."""
    orig_shape = x.shape
    orig_dtype = x.dtype
    n = x.size

    flat = x.reshape(-1)

    # Pad only up to the next multiple of 128 lanes (tiny, and skipped entirely
    # in the common case where n % 128 == 0, e.g. conv feature maps).
    rem = n % _LANES
    needs_pad = rem != 0
    if needs_pad:
        flat = jnp.pad(flat, (0, _LANES - rem))

    rows = flat.shape[0] // _LANES
    x2d = flat.reshape(rows, _LANES)

    # Large blocks (~2 MiB at f32) amortize per-step overhead; for small inputs
    # just take the whole array as a single block (block == full dim is legal).
    block_rows = rows if rows <= tile_rows else tile_rows
    grid = (pl.cdiv(rows, block_rows),)

    # 2 refs (in + out) x double buffering x block, sized at f32, plus headroom.
    block_bytes_f32 = block_rows * _LANES * 4
    vmem_limit = max(32 * 1024 * 1024, 6 * block_bytes_f32)

    out2d = pl.pallas_call(
        _mish_kernel,
        out_shape=jax.ShapeDtypeStruct((rows, _LANES), orig_dtype),
        grid_spec=pltpu.PrefetchScalarGridSpec(
            num_scalar_prefetch=0,
            grid=grid,
            in_specs=[pl.BlockSpec((block_rows, _LANES), lambda i: (i, 0))],
            out_specs=pl.BlockSpec((block_rows, _LANES), lambda i: (i, 0)),
        ),
        compiler_params=pltpu.CompilerParams(
            dimension_semantics=("parallel",),
            vmem_limit_bytes=vmem_limit,
        ),
    )(x2d)

    if needs_pad:
        out = out2d.reshape(-1)[:n].reshape(orig_shape)
    else:
        out = out2d.reshape(orig_shape)
    return out


def mish_reference(x):
    x32 = x.astype(jnp.float32)
    return (x32 * jnp.tanh(jnp.logaddexp(x32, 0.0))).astype(x.dtype)


if __name__ == "__main__":
    key = jax.random.PRNGKey(0)

    # Small NCHW input consistent with typical conv usage of Mish.
    x = jax.random.normal(key, (2, 4, 16, 16), dtype=jnp.float32) * 3.0
    y = jax.block_until_ready(mish(x))
    y_ref = mish_reference(x)
    assert y.shape == x.shape and y.dtype == x.dtype
    assert jnp.max(jnp.abs(y - y_ref)) < 1e-5

    # Exercise the ragged (non-multiple-of-128) padding path as well.
    x2 = jax.random.normal(jax.random.PRNGKey(1), (3, 5, 7), dtype=jnp.float32) * 3.0
    y2 = jax.block_until_ready(mish(x2))
    y2_ref = mish_reference(x2)
    assert y2.shape == x2.shape and y2.dtype == x2.dtype
    assert jnp.max(jnp.abs(y2 - y2_ref)) < 1e-5

    print("KERNEL_OK")
</pallas_src>

<mosaic_0001>
module attributes {stable_mosaic.version = 11 : i64} {
  func.func @_mish_kernel(%arg0: i32, %arg1: memref<16x128xf32, #tpu.memory_space<vmem>>, %arg2: memref<16x128xf32, #tpu.memory_space<vmem>>) attributes {dimension_semantics = [#tpu.dimension_semantics<parallel>], iteration_bounds = array<i64: 1>, scalar_prefetch = 0 : i64, scratch_operands = 0 : i64, tpu.core_type = #tpu.core_type<tc>, window_params = [{transform_indices = @transform_0, window_bounds = array<i64: 16, 128>}, {transform_indices = @transform_1, window_bounds = array<i64: 16, 128>}]} {
    %c0 = arith.constant 0 : index
    %c0_0 = arith.constant 0 : index
    %0 = vector.load %arg1[%c0, %c0_0] : memref<16x128xf32, #tpu.memory_space<vmem>>, vector<16x128xf32>
    %cst = arith.constant 0.000000e+00 : f32
    %1 = vector.broadcast %cst : f32 to vector<16x128xf32>
    %2 = arith.maximumf %0, %1 : vector<16x128xf32>
    %3 = vector.broadcast %cst : f32 to vector<16x128xf32>
    %4 = arith.subf %0, %3 : vector<16x128xf32>
    %5 = arith.cmpf one, %4, %4 : vector<16x128xf32>
    %6 = vector.broadcast %cst : f32 to vector<16x128xf32>
    %7 = arith.addf %0, %6 : vector<16x128xf32>
    %8 = math.absf %4 : vector<16x128xf32>
    %cst_1 = arith.constant 0.000000e+00 : f32
    %9 = vector.broadcast %cst_1 : f32 to vector<16x128xf32>
    %10 = arith.subf %9, %8 : vector<16x128xf32>
    %11 = math.exp %10 : vector<16x128xf32>
    %12 = math.log1p %11 : vector<16x128xf32>
    %13 = arith.addf %2, %12 : vector<16x128xf32>
    %14 = arith.select %5, %7, %13 : vector<16x128xi1>, vector<16x128xf32>
    %15 = math.tanh %14 : vector<16x128xf32>
    %16 = arith.mulf %0, %15 : vector<16x128xf32>
    %c0_2 = arith.constant 0 : index
    %c0_3 = arith.constant 0 : index
    %17 = vector.load %arg2[%c0_2, %c0_3] : memref<16x128xf32, #tpu.memory_space<vmem>>, vector<16x128xf32>
    tpu.vector_store %arg2[%c0_2, %c0_3], %16 {strides = array<i32>} : memref<16x128xf32, #tpu.memory_space<vmem>>, vector<16x128xf32>,
    return
  }
  func.func @transform_0(%arg0: i32) -> (i32, i32) {
    %c0_i32 = arith.constant 0 : i32
    %c0_i32_0 = arith.constant 0 : i32
    return %arg0, %c0_i32 : i32, i32
  }
  func.func @transform_1(%arg0: i32) -> (i32, i32) {
    %c0_i32 = arith.constant 0 : i32
    %c0_i32_0 = arith.constant 0 : i32
    return %arg0, %c0_i32 : i32, i32
  }
}

</mosaic_0001>

<bundles_post_ra>
// kernel: tpu_custom_call.1
= control target key start
LH: loop header
LB: loop body
LE: loop exit
PB: predicated region body
PF: predicated region fallthrough
CT: control target
= control target key end

     0   :  { %6 = vsyncpa [#allocation3], 0  ;;  %s192_s0 = inlined_call_operand.hbm [shape: f32[16,128], index: 0, kind: input, shape index: {}]   ;;  %s193_s1 = inlined_call_operand.hbm [shape: f32[16,128], index: 1, kind: output, shape index: {}]  }
   0x1   :  { %7 = vsyncpa [#allocation4], 0  ;;  %s148_s6 = smov [#allocation2]   ;;  %s100_s10 = scalar_lea.hbm %s192_s0, 256 }
   0x2   :  { %s13_s7 = sshll.u32 %s148_s6, 4  ;;  %p101_p0 = scmp.ne.s32.totalorder %s192_s0, %s100_s10  ;;  %s14_s7 = int_to_ptr.vmem [resolvable:$true] %s13_s7 }
   0x3   :  { %p104_p1 = scmp.lt.u32.totalorder %s100_s10, %s192_s0 }
   0x5   :  { %p106_p2 = pnand %p104_p1, %p101_p0 }
   0x7   :  { %109 = shalt.err (!%p106_p2)
}
   0x8   :  { %s110_s15 = scalar_lea.vmem %s14_s7, 256  ;;  %p115_p4 = scmp.lt.s32.totalorder %s14_s7, %s14_s7 }
   0x9   :  { %p111_p3 = scmp.ne.s32.totalorder %s14_s7, %s110_s15  ;;  %p116_p5 = scmp.lt.s32.totalorder %s110_s15, %s110_s15 }
   0xb   :  { %p117_p6 = por %p116_p5, %p115_p4 }
   0xd   :  { %p118_p7 = pnand %p117_p6, %p111_p3 }
   0xf   :  { %121 = shalt.err (!%p118_p7)
}
  0x10   :  { %s149_s16 = smov 128   ;;  %s150_s17 = smov 8  }
  0x11   :  { %19 = dma.hbm_to_vmem [thread:$0]  %s192_s0, 256, %s14_s7, [#allocation3], %s149_s16, %s149_s16, %s150_s17  }
  0x12   :  { %144 = dma.done.wait [#allocation3], 256  }
  0x13   :  { %145 = vsyncadd [#allocation3], 4294967040  ;;  %v23_v0 = vld [vmem:[#allocation2] sm:$0xff]  ;;  %v24_v1 = vld [vmem:[#allocation2 + $0x8] sm:$0xff]  ;;  %s151_s0 = smov [#allocation5]  }
  0x14   :  { %v31_v2 = vand.u32 2147483647, %v23_v0  ;;  %v32_v3 = vand.u32 2147483647, %v24_v1  ;;  %v25_v20 = vmax.f32 %v23_v0, 0.0  ;;  %v26_v24 = vmax.f32 %v24_v1, 0.0 }
  0x15   :  { %vm27_vm2 = vcmp.ne.f32.partialorder %v23_v0, %v23_v0  ;;  %vm28_vm3 = vcmp.ne.f32.partialorder %v24_v1, %v24_v1  ;;  %s72_s20 = sshll.u32 %s151_s0, 4  ;;  %s73_s20 = int_to_ptr.vmem [resolvable:$true] %s72_s20 }
  0x16   :  { %v33_v4 = vsub.f32 0.0, %v31_v2  ;;  %v34_v5 = vsub.f32 0.0, %v32_v3  ;;  %s122_s21 = scalar_lea.vmem %s73_s20, 256  ;;  %p127_p9 = scmp.lt.s32.totalorder %s73_s20, %s73_s20 }
  0x17   :  { %p123_p8 = scmp.ne.s32.totalorder %s73_s20, %s122_s21  ;;  %p128_p10 = scmp.lt.s32.totalorder %s122_s21, %s122_s21 }
  0x18   :  { %v35_v6 = vmul.f32 1.442695, %v33_v4  ;;  %v37_v7 = vmul.f32 1.442695, %v34_v5 }
  0x19   :  { %p129_p11 = por %p128_p10, %p127_p9 }
  0x1a   :  { %88 = vpow2.f32 %v35_v6 }
  0x1b   :  { %90 = vpow2.f32 %v37_v7  ;;  %p130_p12 = pnand %p129_p11, %p123_p8 }
  0x24   :  { %v89_v8 = vpop.eup %88 }
  0x25   :  { %v91_v9 = vpop.eup %90  ;;  %v39_v10 = vadd.f32 1.0, %v89_v8  ;;  %v42_v12 = vmul.f32 -0.5, %v89_v8  ;;  %v45_v15 = vand.u32 2147483647, %v89_v8 }
  0x26   :  { %v48_v11 = vadd.f32 1.0, %v91_v9  ;;  %v51_v13 = vmul.f32 -0.5, %v91_v9  ;;  %v54_v17 = vand.u32 2147483647, %v91_v9 }
  0x27   :  { %92 = vlog2.f32 %v39_v10  ;;  %v43_v14 = vadd.f32 1.0, %v42_v12  ;;  %vm46_vm0 = vcmp.lt.f32.partialorder %v45_v15, 0.0004427343 }
  0x28   :  { %94 = vlog2.f32 %v48_v11  ;;  %v52_v16 = vadd.f32 1.0, %v51_v13  ;;  %vm55_vm1 = vcmp.lt.f32.partialorder %v54_v17, 0.0004427343 }
  0x29   :  { %v44_v18 = vmul.f32 %v89_v8, %v43_v14 }
  0x2a   :  { %v53_v21 = vmul.f32 %v91_v9, %v52_v16 }
  0x31   :  { %v93_v19 = vpop.eup %92 }
  0x32   :  { %v95_v22 = vpop.eup %94  ;;  %v41_v23 = vmul.f32 0.6931472, %v93_v19 }
  0x33   :  { %v50_v25 = vmul.f32 0.6931472, %v95_v22 }
  0x34   :  { %v47_v26 = vsel %vm46_vm0, %v44_v18, %v41_v23 }
  0x35   :  { %v57_v27 = vadd.f32 %v47_v26, %v25_v20  ;;  %v56_v28 = vsel %vm55_vm1, %v53_v21, %v50_v25 }
  0x36   :  { %v58_v29 = vadd.f32 %v56_v28, %v26_v24 }
  0x37   :  { %v59_v30 = vsel %vm27_vm2, %v23_v0, %v57_v27 }
  0x38   :  { %96 = vtanh.f32 %v59_v30  ;;  %v60_v31 = vsel %vm28_vm3, %v24_v1, %v58_v29 }
  0x39   :  { %98 = vtanh.f32 %v60_v31 }
  0x42   :  { %v97_v32 = vpop.eup %96 }
  0x43   :  { %v99_v33 = vpop.eup %98  ;;  %v63_v34 = vmul.f32 %v97_v32, %v23_v0 }
  0x44   :  { %v64_v35 = vmul.f32 %v99_v33, %v24_v1 }
  0x45   :  { %65 = vst [vmem:[#allocation5] sm:$0xff] %v63_v34 }
  0x46   :  { %66 = vst [vmem:[#allocation5 + $0x8] sm:$0xff] %v64_v35 }
  0x47   :  { %133 = shalt.err (!%p130_p12)
}
  0x48   :  { %s134_s24 = scalar_lea.hbm %s193_s1, 256 }
  0x49   :  { %p135_p13 = scmp.ne.s32.totalorder %s193_s1, %s134_s24  ;;  %p138_p0 = scmp.lt.u32.totalorder %s134_s24, %s193_s1 }
  0x4b   :  { %p140_p1 = pnand %p138_p0, %p135_p13 }
  0x4d   :  { %143 = shalt.err (!%p140_p1)
}
  0x4e   :  { %78 = dma.vmem_to_hbm [thread:$0]  %s73_s20, 256, %s193_s1, [#allocation4], %s149_s16, %s149_s16, %s150_s17  }
  0x4f   :  { %146 = dma.done.wait [#allocation4], 256  }
  0x50   :  { %147 = vsyncadd [#allocation4], 4294967040 }
  0x51   :  { %82 = vsyncpa [#allocation3], 1 }
  0x52   :  { %83 = vsyncpa [#allocation4], 1 }

</bundles_post_ra>
